<compile_context>
chip_gen: v7x
topology: tpu7x:2x2x1
jax: 0.10.0
libtpu: 0.0.40
codegen_flags: <defaults>
</compile_context>

<pallas_src>
import functools

import jax
import jax.numpy as jnp
import numpy as np
from jax.experimental import pallas as pl
from jax.experimental.pallas import tpu as pltpu

_LANES = 128
_UNROLLED_BATCH_LIMIT = 16   # above this, switch to lax.fori_loop(unroll=4)


def _grid_metric_kernel(delta_ref, out_ref, *,
                        batch_size, grid_size, image_size, rows, lanes):
    """delta_ref: (1, B*6) f32 SMEM block (theta - theta_GT for one evaluation).
    out_ref:   (1, 1)   f32 SMEM block (the scalar metric for this evaluation).
    """
    N = grid_size * grid_size

    # In-kernel generation of the fixed grid P (no tensor input, no DMA).
    # Flattened point index n -> (i, j) = (n // grid_size, n % grid_size),
    #   X[n] = -1 + 2*j/(grid_size-1),  Y[n] = -1 + 2*i/(grid_size-1)
    # matching np.meshgrid(axis, axis) flattened row-major.
    row_i = jax.lax.broadcasted_iota(jnp.int32, (rows, lanes), 0)
    col_i = jax.lax.broadcasted_iota(jnp.int32, (rows, lanes), 1)
    idx = row_i * lanes + col_i
    valid = idx < N

    idx_f = idx.astype(jnp.float32)
    # +0.5 pre-offset: robust against the f32 reciprocal rounding low at
    # idx = k * grid_size for arbitrary grid_size (one extra one-time add).
    ii = jnp.floor((idx_f + 0.5) * (1.0 / grid_size))   # slow meshgrid axis -> Y
    jj = idx_f - ii * grid_size                          # fast meshgrid axis -> X
    step = 2.0 / (grid_size - 1)
    X = jj * step - 1.0
    Y = ii * step - 1.0

    def add_batch(total, base):
        # 6 SMEM scalar reads per batch; deltas pre-subtracted in the wrapper,
        # so dx = d0*X + d1*Y + d2 directly gives P' - P'_GT (x component).
        d0 = delta_ref[0, base + 0]
        d1 = delta_ref[0, base + 1]
        d2 = delta_ref[0, base + 2]
        d3 = delta_ref[0, base + 3]
        d4 = delta_ref[0, base + 4]
        d5 = delta_ref[0, base + 5]
        dx = d0 * X + d1 * Y + d2
        dy = d3 * X + d4 * Y + d5
        # Accumulate unmasked; the batch-independent pad mask is applied once
        # after the loop.
        return total + jnp.sqrt(dx * dx + dy * dy)

    total = jnp.zeros((rows, lanes), jnp.float32)
    if batch_size <= _UNROLLED_BATCH_LIMIT:
        # Small static B: fully unrolled Python loop.
        for b in range(batch_size):
            total = add_batch(total, b * 6)
    else:
        # Large B: bounded code size, keep LLO scheduler visibility (unroll=4).
        total = jax.lax.fori_loop(
            0, batch_size, lambda b, t: add_batch(t, b * 6), total, unroll=4)

    # Mask padded slots once, single cross-lane reduction, one combined scale:
    # mean over N points, mean over batch, * image_size / 2.
    total = jnp.where(valid, total, 0.0)
    scale = (image_size * 0.5) / float(N * batch_size)
    out_ref[0, 0] = jnp.sum(total) * scale


def grid_metric_batched(theta, theta_gt, *, grid_size=20, image_size=256):
    """Evaluate the metric for M stacked (theta, theta_GT) pairs in ONE call.

    theta, theta_gt: (M, B, 6) float32.  Returns (M,) float32.
    Amortizes pallas_call fixed overhead over M evaluations and (on v7x)
    shards the M axis across both TensorCores.
    """
    theta = jnp.asarray(theta, jnp.float32)
    theta_gt = jnp.asarray(theta_gt, jnp.float32)
    assert theta.ndim == 3 and theta.shape[-1] == 6
    assert theta.shape == theta_gt.shape
    M, B, _ = theta.shape
    N = grid_size * grid_size

    lanes = _LANES
    # Dense tile big enough for N points, sublane dim a multiple of 8.
    rows = max(8, ((-(-N // lanes)) + 7) // 8 * 8)

    # Pre-subtracted deltas: one SMEM operand, 6 scalar reads / batch in-kernel.
    delta = (theta - theta_gt).reshape(M, B * 6)

    kernel = functools.partial(
        _grid_metric_kernel,
        batch_size=B, grid_size=grid_size, image_size=float(image_size),
        rows=rows, lanes=lanes)

    out = pl.pallas_call(
        kernel,
        out_shape=jax.ShapeDtypeStruct((M, 1), jnp.float32),
        grid=(M,),
        in_specs=[pl.BlockSpec((1, B * 6), lambda m: (m, 0),
                               memory_space=pltpu.SMEM)],
        out_specs=pl.BlockSpec((1, 1), lambda m: (m, 0),
                               memory_space=pltpu.SMEM),
        compiler_params=pltpu.CompilerParams(
            dimension_semantics=("parallel",)),
    )(delta)
    return out[:, 0]


def grid_metric(theta, theta_gt, *, grid_size=20, image_size=256):
    """Single (B, 6) pair -> scalar f32 metric.

    (For a genuinely one-off scalar this is dispatch-overhead bound; the
    Pallas path pays off when many pairs are stacked via grid_metric_batched.)
    """
    out = grid_metric_batched(theta[None], theta_gt[None],
                              grid_size=grid_size, image_size=image_size)
    return out[0]


def _grid_metric_ref(theta, theta_gt, *, grid_size=20, image_size=256):
    """Pure-JAX reference mirroring the PyTorch forward (affine path)."""
    B = theta.shape[0]
    N = grid_size * grid_size
    axis_coords = np.linspace(-1.0, 1.0, grid_size)
    Xg, Yg = np.meshgrid(axis_coords, axis_coords)
    P = np.concatenate(
        (Xg.reshape(1, 1, N), Yg.reshape(1, 1, N)), axis=1).astype(np.float32)
    P = jnp.broadcast_to(jnp.asarray(P), (B, 2, N))

    def aff(th):
        m = th.reshape(B, 2, 3)
        return jnp.einsum('bij,bjn->bin', m[:, :, :2], P) + m[:, :, 2:]

    Pp = aff(theta)
    Pg = aff(theta_gt)
    d = jnp.sqrt(jnp.sum(jnp.abs(Pp - Pg) ** 2, axis=1))   # (B, N)
    return jnp.mean(jnp.mean(d, axis=1)) * image_size / 2


if __name__ == "__main__":
    key = jax.random.PRNGKey(0)
    grid_size, image_size = 20, 256
    identity = jnp.array([1.0, 0.0, 0.0, 0.0, 1.0, 0.0], jnp.float32)
    k1, k2, k3, k4 = jax.random.split(key, 4)

    # --- 1) Single pair, small batch (unrolled in-kernel loop path) ---------
    B = 2
    theta = identity[None, :] + 0.1 * jax.random.normal(k1, (B, 6), jnp.float32)
    theta_gt = identity[None, :] + 0.1 * jax.random.normal(k2, (B, 6), jnp.float32)

    out = grid_metric(theta, theta_gt, grid_size=grid_size,
                      image_size=image_size)
    out = jax.block_until_ready(out)
    ref = _grid_metric_ref(theta, theta_gt, grid_size=grid_size,
                           image_size=image_size)
    np.testing.assert_allclose(np.asarray(out), np.asarray(ref),
                               rtol=1e-4, atol=1e-3)

    # --- 2) M stacked pairs, larger batch (fori_loop path), one call --------
    M, B2 = 4, 24
    theta_s = (identity[None, None, :]
               + 0.1 * jax.random.normal(k3, (M, B2, 6), jnp.float32))
    theta_gt_s = (identity[None, None, :]
                  + 0.1 * jax.random.normal(k4, (M, B2, 6), jnp.float32))

    out_s = grid_metric_batched(theta_s, theta_gt_s, grid_size=grid_size,
                                image_size=image_size)
    out_s = jax.block_until_ready(out_s)
    ref_s = np.array([
        np.asarray(_grid_metric_ref(theta_s[m], theta_gt_s[m],
                                    grid_size=grid_size,
                                    image_size=image_size))
        for m in range(M)
    ])
    np.testing.assert_allclose(np.asarray(out_s), ref_s,
                               rtol=1e-4, atol=1e-3)

    print("KERNEL_OK")
</pallas_src>

<mosaic_0001>
module attributes {stable_mosaic.version = 11 : i64} {
  func.func @_grid_metric_kernel(%arg0: i32, %arg1: memref<1x12xf32, #tpu.memory_space<smem>>, %arg2: memref<1x1xf32, #tpu.memory_space<smem>>) attributes {dimension_semantics = [#tpu.dimension_semantics<parallel>], iteration_bounds = array<i64: 1>, scalar_prefetch = 0 : i64, scratch_operands = 0 : i64, tpu.core_type = #tpu.core_type<tc>, window_params = [{transform_indices = @transform_0, window_bounds = array<i64: 1, 12>}, {transform_indices = @transform_1, window_bounds = array<i64: 1, 1>}]} {
    %0 = tpu.iota {dimensions = array<i32: 0>} : vector<8x128xi32>
    %1 = tpu.iota {dimensions = array<i32: 1>} : vector<8x128xi32>
    %c128_i32 = arith.constant 128 : i32
    %2 = vector.broadcast %c128_i32 : i32 to vector<8x128xi32>
    %3 = arith.muli %0, %2 : vector<8x128xi32>
    %4 = arith.addi %3, %1 : vector<8x128xi32>
    %c400_i32 = arith.constant 400 : i32
    %5 = vector.broadcast %c400_i32 : i32 to vector<8x128xi32>
    %6 = arith.cmpi slt, %4, %5 : vector<8x128xi32>
    %7 = arith.sitofp %4 : vector<8x128xi32> to vector<8x128xf32>
    %cst = arith.constant 5.000000e-01 : f32
    %8 = vector.broadcast %cst : f32 to vector<8x128xf32>
    %9 = arith.addf %7, %8 : vector<8x128xf32>
    %cst_0 = arith.constant 5.000000e-02 : f32
    %10 = vector.broadcast %cst_0 : f32 to vector<8x128xf32>
    %11 = arith.mulf %9, %10 : vector<8x128xf32>
    %12 = math.floor %11 : vector<8x128xf32>
    %cst_1 = arith.constant 2.000000e+01 : f32
    %13 = vector.broadcast %cst_1 : f32 to vector<8x128xf32>
    %14 = arith.mulf %12, %13 : vector<8x128xf32>
    %15 = arith.subf %7, %14 : vector<8x128xf32>
    %cst_2 = arith.constant 0.105263159 : f32
    %16 = vector.broadcast %cst_2 : f32 to vector<8x128xf32>
    %17 = arith.mulf %15, %16 : vector<8x128xf32>
    %cst_3 = arith.constant 1.000000e+00 : f32
    %18 = vector.broadcast %cst_3 : f32 to vector<8x128xf32>
    %19 = arith.subf %17, %18 : vector<8x128xf32>
    %cst_4 = arith.constant 0.105263159 : f32
    %20 = vector.broadcast %cst_4 : f32 to vector<8x128xf32>
    %21 = arith.mulf %12, %20 : vector<8x128xf32>
    %cst_5 = arith.constant 1.000000e+00 : f32
    %22 = vector.broadcast %cst_5 : f32 to vector<8x128xf32>
    %23 = arith.subf %21, %22 : vector<8x128xf32>
    %cst_6 = arith.constant 0.000000e+00 : f32
    %24 = vector.broadcast %cst_6 : f32 to vector<8x128xf32>
    %c0 = arith.constant 0 : index
    %c0_7 = arith.constant 0 : index
    %25 = memref.load %arg1[%c0, %c0_7] : memref<1x12xf32, #tpu.memory_space<smem>>
    %c0_8 = arith.constant 0 : index
    %c1 = arith.constant 1 : index
    %26 = memref.load %arg1[%c0_8, %c1] : memref<1x12xf32, #tpu.memory_space<smem>>
    %c0_9 = arith.constant 0 : index
    %c2 = arith.constant 2 : index
    %27 = memref.load %arg1[%c0_9, %c2] : memref<1x12xf32, #tpu.memory_space<smem>>
    %c0_10 = arith.constant 0 : index
    %c3 = arith.constant 3 : index
    %28 = memref.load %arg1[%c0_10, %c3] : memref<1x12xf32, #tpu.memory_space<smem>>
    %c0_11 = arith.constant 0 : index
    %c4 = arith.constant 4 : index
    %29 = memref.load %arg1[%c0_11, %c4] : memref<1x12xf32, #tpu.memory_space<smem>>
    %c0_12 = arith.constant 0 : index
    %c5 = arith.constant 5 : index
    %30 = memref.load %arg1[%c0_12, %c5] : memref<1x12xf32, #tpu.memory_space<smem>>
    %31 = vector.broadcast %25 : f32 to vector<8x128xf32>
    %32 = arith.mulf %31, %19 : vector<8x128xf32>
    %33 = vector.broadcast %26 : f32 to vector<8x128xf32>
    %34 = arith.mulf %33, %23 : vector<8x128xf32>
    %35 = arith.addf %32, %34 : vector<8x128xf32>
    %36 = vector.broadcast %27 : f32 to vector<8x128xf32>
    %37 = arith.addf %35, %36 : vector<8x128xf32>
    %38 = vector.broadcast %28 : f32 to vector<8x128xf32>
    %39 = arith.mulf %38, %19 : vector<8x128xf32>
    %40 = vector.broadcast %29 : f32 to vector<8x128xf32>
    %41 = arith.mulf %40, %23 : vector<8x128xf32>
    %42 = arith.addf %39, %41 : vector<8x128xf32>
    %43 = vector.broadcast %30 : f32 to vector<8x128xf32>
    %44 = arith.addf %42, %43 : vector<8x128xf32>
    %45 = arith.mulf %37, %37 : vector<8x128xf32>
    %46 = arith.mulf %44, %44 : vector<8x128xf32>
    %47 = arith.addf %45, %46 : vector<8x128xf32>
    %48 = math.sqrt %47 : vector<8x128xf32>
    %49 = arith.addf %24, %48 : vector<8x128xf32>
    %c0_13 = arith.constant 0 : index
    %c6 = arith.constant 6 : index
    %50 = memref.load %arg1[%c0_13, %c6] : memref<1x12xf32, #tpu.memory_space<smem>>
    %c0_14 = arith.constant 0 : index
    %c7 = arith.constant 7 : index
    %51 = memref.load %arg1[%c0_14, %c7] : memref<1x12xf32, #tpu.memory_space<smem>>
    %c0_15 = arith.constant 0 : index
    %c8 = arith.constant 8 : index
    %52 = memref.load %arg1[%c0_15, %c8] : memref<1x12xf32, #tpu.memory_space<smem>>
    %c0_16 = arith.constant 0 : index
    %c9 = arith.constant 9 : index
    %53 = memref.load %arg1[%c0_16, %c9] : memref<1x12xf32, #tpu.memory_space<smem>>
    %c0_17 = arith.constant 0 : index
    %c10 = arith.constant 10 : index
    %54 = memref.load %arg1[%c0_17, %c10] : memref<1x12xf32, #tpu.memory_space<smem>>
    %c0_18 = arith.constant 0 : index
    %c11 = arith.constant 11 : index
    %55 = memref.load %arg1[%c0_18, %c11] : memref<1x12xf32, #tpu.memory_space<smem>>
    %56 = vector.broadcast %50 : f32 to vector<8x128xf32>
    %57 = arith.mulf %56, %19 : vector<8x128xf32>
    %58 = vector.broadcast %51 : f32 to vector<8x128xf32>
    %59 = arith.mulf %58, %23 : vector<8x128xf32>
    %60 = arith.addf %57, %59 : vector<8x128xf32>
    %61 = vector.broadcast %52 : f32 to vector<8x128xf32>
    %62 = arith.addf %60, %61 : vector<8x128xf32>
    %63 = vector.broadcast %53 : f32 to vector<8x128xf32>
    %64 = arith.mulf %63, %19 : vector<8x128xf32>
    %65 = vector.broadcast %54 : f32 to vector<8x128xf32>
    %66 = arith.mulf %65, %23 : vector<8x128xf32>
    %67 = arith.addf %64, %66 : vector<8x128xf32>
    %68 = vector.broadcast %55 : f32 to vector<8x128xf32>
    %69 = arith.addf %67, %68 : vector<8x128xf32>
    %70 = arith.mulf %62, %62 : vector<8x128xf32>
    %71 = arith.mulf %69, %69 : vector<8x128xf32>
    %72 = arith.addf %70, %71 : vector<8x128xf32>
    %73 = math.sqrt %72 : vector<8x128xf32>
    %74 = arith.addf %49, %73 : vector<8x128xf32>
    %cst_19 = arith.constant 0.000000e+00 : f32
    %75 = vector.broadcast %cst_19 : f32 to vector<8x128xf32>
    %76 = arith.select %6, %74, %75 : vector<8x128xi1>, vector<8x128xf32>
    %77 = vector.shape_cast %76 : vector<8x128xf32> to vector<1x8x128xf32>
    %cst_20 = arith.constant dense<0.000000e+00> : vector<1xf32>
    %78 = vector.multi_reduction <add>, %77, %cst_20 [1, 2] : vector<1x8x128xf32> to vector<1xf32>
    %79 = vector.shape_cast %78 : vector<1xf32> to vector<1x1x1xf32>
    %80 = vector.extract %79[0, 0, 0] : f32 from vector<1x1x1xf32>
    %cst_21 = arith.constant 1.600000e-01 : f32
    %81 = arith.mulf %80, %cst_21 : f32
    %c0_22 = arith.constant 0 : index
    %c0_23 = arith.constant 0 : index
    %82 = memref.load %arg2[%c0_22, %c0_23] : memref<1x1xf32, #tpu.memory_space<smem>>
    memref.store %81, %arg2[%c0_22, %c0_23] : memref<1x1xf32, #tpu.memory_space<smem>>
    return
  }
  func.func @transform_0(%arg0: i32) -> (i32, i32) {
    %c0_i32 = arith.constant 0 : i32
    %c0_i32_0 = arith.constant 0 : i32
    return %arg0, %c0_i32 : i32, i32
  }
  func.func @transform_1(%arg0: i32) -> (i32, i32) {
    %c0_i32 = arith.constant 0 : i32
    %c0_i32_0 = arith.constant 0 : i32
    return %arg0, %c0_i32 : i32, i32
  }
}

</mosaic_0001>

<bundles_post_ra>
// kernel: tpu_custom_call.1
= control target key start
LH: loop header
LB: loop body
LE: loop exit
PB: predicated region body
PF: predicated region fallthrough
CT: control target
= control target key end

     0   :  { %6 = vsyncpa [#allocation3], 0  ;;  %s223_s0 = inlined_call_operand.hbm [shape: f32[1,12], index: 0, kind: input, shape index: {}]   ;;  %s224_s1 = inlined_call_operand.hbm [shape: f32[1,1], index: 1, kind: output, shape index: {}]  }
   0x1   :  { %7 = vsyncpa [#allocation4], 0  ;;  %s147_s8 = scalar_lea.hbm %s223_s0, 16 }
   0x2   :  { %p148_p0 = scmp.ne.s32.totalorder %s223_s0, %s147_s8  ;;  %p151_p1 = scmp.lt.u32.totalorder %s147_s8, %s223_s0 }
   0x4   :  { %p153_p2 = pnand %p151_p1, %p148_p0 }
   0x6   :  { %156 = shalt.err (!%p153_p2)
}
   0x7   :  { %s171_s13 = smov [#allocation2]  }
   0x8   :  { %15 = dma.hbm_to_smem %s223_s0, 16, %s171_s13, [#allocation3]  }
   0x9   :  { %167 = dma.done.wait [#allocation3], 16  }
   0xa   :  { %168 = vsyncadd [#allocation3], 4294967280 }
   0xb   :  { %19 = sfence }
   0xc   :  { %v20_v0 = vlaneseq  ;;  %s128_s16 = sld [smem:[#allocation2 + $0x1]]  ;;  %s131_s17 = sld [smem:[#allocation2 + $0x4]] }
   0xd   :  { %s134_s18 = sld [smem:[#allocation2 + $0x7]]  ;;  %s137_s19 = sld [smem:[#allocation2 + $0xa]] }
   0xe   :  { %v21_v1 = vshrl.u32 %v20_v0, 7  ;;  %v23_v2 = vand.u32 127, %v20_v0  ;;  %s37_s20 = sld [smem:[#allocation2]]  ;;  %s130_s21 = sld [smem:[#allocation2 + $0x3]] }
   0xf   :  { %s133_s0 = sld [smem:[#allocation2 + $0x6]]  ;;  %s136_s22 = sld [smem:[#allocation2 + $0x9]] }
  0x10   :  { %v24_v3 = vmul.u32 128, %v21_v1  ;;  %s198_s23 = sld [smem:[#allocation2 + $0x2]]  ;;  %s200_s24 = sld [smem:[#allocation2 + $0x5]] }
  0x11   :  { %s202_s25 = sld [smem:[#allocation2 + $0x8]]  ;;  %s204_s26 = sld [smem:[#allocation2 + $0xb]] }
  0x12   :  { %v195_v4 = vadd.s32 %v24_v3, %v23_v2  ;;  %v45_v13 = vstv %s128_s16  ;;  %v52_v14 = vstv %s131_s17  ;;  %s157_s2 = scalar_lea.hbm %s224_s1, 16 }
  0x13   :  { %v76_v15 = vstv %s134_s18  ;;  %v83_v16 = vstv %s137_s19  ;;  %p158_p3 = scmp.ne.s32.totalorder %s224_s1, %s157_s2  ;;  %p161_p4 = scmp.lt.u32.totalorder %s157_s2, %s224_s1 }
  0x14   :  { %v27_v5 = vcvt.s32.f32 %v195_v4  ;;  %v43_v18 = vstv %s37_s20  ;;  %v50_v20 = vstv %s130_s21  ;;  %vm26_vm4 = vcmp.lt.s32.totalorder %v195_v4, 400 }
  0x15   :  { %v74_v21 = vstv %s133_s0  ;;  %v81_v22 = vstv %s136_s22  ;;  %p163_p5 = pnand %p161_p4, %p158_p3 }
  0x16   :  { %v28_v6 = vadd.f32 0.5, %v27_v5  ;;  %v48_v31 = vstv %s198_s23  ;;  %v55_v32 = vstv %s200_s24 }
  0x17   :  { %v79_v33 = vstv %s202_s25  ;;  %v86_v34 = vstv %s204_s26 }
  0x18   :  { %v29_v7 = vmul.f32 0.05, %v28_v6 }
  0x1a   :  { %v30_v8 = vfloor.f32 %v29_v7 }
  0x1c   :  { %v31_v9 = vmul.f32 20.0, %v30_v8  ;;  %v35_v10 = vmul.f32 0.10526316, %v30_v8 }
  0x1e   :  { %v32_v11 = vsub.f32 %v27_v5, %v31_v9  ;;  %v127_v12 = vadd.f32 -1.0, %v35_v10 }
  0x20   :  { %v33_v17 = vmul.f32 0.10526316, %v32_v11  ;;  %v46_v19 = vmul.f32 %v127_v12, %v45_v13  ;;  %v53_v24 = vmul.f32 %v127_v12, %v52_v14  ;;  %v77_v25 = vmul.f32 %v127_v12, %v76_v15 }
  0x21   :  { %v84_v26 = vmul.f32 %v127_v12, %v83_v16 }
  0x22   :  { %v126_v23 = vadd.f32 -1.0, %v33_v17 }
  0x24   :  { %v44_v27 = vmul.f32 %v126_v23, %v43_v18  ;;  %v51_v28 = vmul.f32 %v126_v23, %v50_v20  ;;  %v75_v29 = vmul.f32 %v126_v23, %v74_v21  ;;  %v82_v30 = vmul.f32 %v126_v23, %v81_v22 }
  0x26   :  { %v47_v35 = vadd.f32 %v46_v19, %v44_v27  ;;  %v54_v36 = vadd.f32 %v53_v24, %v51_v28  ;;  %v78_v37 = vadd.f32 %v77_v25, %v75_v29  ;;  %v85_v38 = vadd.f32 %v84_v26, %v82_v30 }
  0x28   :  { %v49_v39 = vadd.f32 %v48_v31, %v47_v35  ;;  %v56_v40 = vadd.f32 %v55_v32, %v54_v36  ;;  %v80_v41 = vadd.f32 %v79_v33, %v78_v37  ;;  %v87_v42 = vadd.f32 %v86_v34, %v85_v38 }
  0x2a   :  { %v57_v43 = vmul.f32 %v49_v39, %v49_v39  ;;  %v58_v44 = vmul.f32 %v56_v40, %v56_v40  ;;  %v88_v45 = vmul.f32 %v80_v41, %v80_v41  ;;  %v89_v46 = vmul.f32 %v87_v42, %v87_v42 }
  0x2c   :  { %v59_v47 = vadd.f32 %v58_v44, %v57_v43  ;;  %v90_v48 = vadd.f32 %v89_v46, %v88_v45 }
  0x2e   :  { %143 = vrsqrt.f32 %v59_v47  ;;  %vm62_vm0 = vcmp.eq.f32.partialorder %v59_v47, inf  ;;  %v65_v50 = vand.u32 2147483648, %v59_v47  ;;  %vm64_vm1 = vcmp.eq.f32.partialorder %v59_v47, 0.0 }
  0x2f   :  { %145 = vrsqrt.f32 %v90_v48  ;;  %vm93_vm2 = vcmp.eq.f32.partialorder %v90_v48, inf  ;;  %v96_v53 = vand.u32 2147483648, %v90_v48  ;;  %vm95_vm3 = vcmp.eq.f32.partialorder %v90_v48, 0.0 }
  0x38   :  { %v144_v49 = vpop.eup %143 }
  0x39   :  { %v146_v51 = vpop.eup %145  ;;  %v61_v52 = vmul.f32 %v144_v49, %v59_v47 }
  0x3a   :  { %v92_v54 = vmul.f32 %v146_v51, %v90_v48 }
  0x3b   :  { %v63_v55 = vsel %vm62_vm0, %v59_v47, %v61_v52 }
  0x3c   :  { %v66_v56 = vsel %vm64_vm1, %v65_v50, %v63_v55  ;;  %v94_v57 = vsel %vm93_vm2, %v90_v48, %v92_v54 }
  0x3d   :  { %v97_v58 = vsel %vm95_vm3, %v96_v53, %v94_v57 }
  0x3e   :  { %v98_v59 = vadd.f32 %v97_v58, %v66_v56 }
  0x40   :  { %v99_v60 = vsel %vm26_vm4, %v98_v59, 0.0 }
  0x41   :  { %100 = vadd.xlane.f32.xlu0 %v99_v60 }
  0xce   :  { %v101_v61 = vpop.xlane.xlu0 %100 }
  0xcf   :  { %v102_v62 = vrot.slane %v101_v61, 4 }
  0xd1   :  { %v103_v63 = vadd.f32 %v102_v62, %v101_v61 }
  0xd3   :  { %v104_v0 = vrot.slane %v103_v63, 2 }
  0xd5   :  { %v105_v1 = vadd.f32 %v104_v0, %v103_v63 }
  0xd7   :  { %v106_v2 = vrot.slane %v105_v1, 1 }
  0xd9   :  { %v107_v3 = vadd.f32 %v106_v2, %v105_v1 }
  0xdb   :  { %139 = vpush %v107_v3 }
 0x10c   :  { %s140_s27 = spop %139 }
 0x10d   :  { %s109_s28 = smul.f32 0.16, %s140_s27 }
 0x10f   :  { %111 = sst [smem:[#allocation5]] %s109_s28 }
 0x110   :  { %166 = shalt.err (!%p163_p5)
}
 0x111   :  { %s172_s7 = smov [#allocation5]  }
 0x112   :  { %119 = dma.smem_to_hbm %s172_s7, 16, %s224_s1, [#allocation4]  }
 0x113   :  { %169 = dma.done.wait [#allocation4], 16  }
 0x114   :  { %170 = vsyncadd [#allocation4], 4294967280 }
 0x115   :  { %123 = sfence }
 0x116   :  { %124 = vsyncpa [#allocation3], 1 }
 0x117   :  { %125 = vsyncpa [#allocation4], 1 }

</bundles_post_ra>
